<compile_context>
chip_gen: v7x
topology: tpu7x:2x2x1
jax: 0.10.0
libtpu: 0.0.40
codegen_flags: <defaults>
</compile_context>

<pallas_src>
import functools

import jax
import jax.numpy as jnp
import numpy as np
from jax.experimental import pallas as pl
from jax.experimental.pallas import tpu as pltpu

SCALE_WEIGHT = 0.5 ** 0.5
_LANE = 128   # TPU lane width; L is padded up to a multiple of this
_HALO = 128   # lane-aligned halo on each side of the conv scratch (>= width//2)


def _stacked_cnn_kernel(x_ref, w_ref, b_ref, o_ref, xpad_ref, *, seq_len, width):
    """One (batch-block, layer) grid step.

    x_ref    : [Bb, C, L_pad]           f32   input (DMA'd once per batch block; read at layer 0)
    w_ref    : [1, width, 2C, C]        bf16  this layer's per-tap conv weights (streamed)
    b_ref    : [num_layers, 2C, 1]      f32   all biases, resident (indexed by `layer`)
    o_ref    : [Bb, C, L_pad]           f32   output block; ALSO the running-activation carry
    xpad_ref : [Bb, C, L_pad + 2*HALO]  bf16  zero-halo conv window scratch
    """
    layer = pl.program_id(1)
    Bb, C, L_pad = o_ref.shape
    pad = width // 2
    off = _HALO                                   # 128-lane-aligned interior start

    @pl.when(layer == 0)
    def _():
        # Seed the carry: the resident output block doubles as the running activation.
        o_ref[...] = x_ref[...]
        # Zero only the halo columns once; the interior is rewritten every layer.
        xpad_ref[:, :, :off] = jnp.zeros((Bb, C, off), xpad_ref.dtype)
        xpad_ref[:, :, off + L_pad:] = jnp.zeros((Bb, C, off), xpad_ref.dtype)

    bias = b_ref[layer]                           # [2C, 1] f32, no per-layer DMA
    w_taps = [w_ref[0, k] for k in range(width)]  # each [2C, C] bf16, loaded once

    for b in range(Bb):                           # static unroll over the batch block
        x = o_ref[b]                              # [C, L_pad] f32 running activation
        # Conv input in bf16; the zero halos provide the "same" zero padding.
        xpad_ref[b, :, off:off + L_pad] = x.astype(jnp.bfloat16)
        if seq_len < L_pad:
            # Only the conv INPUT needs zeros beyond the true sequence length.
            # (The carry/output may hold junk there; the wrapper slices [:, :, :L].)
            xpad_ref[b, :, off + seq_len:off + L_pad] = jnp.zeros(
                (C, L_pad - seq_len), xpad_ref.dtype)

        # `width` accumulating MXU matmuls (K = C) on shifted windows of the
        # zero-halo scratch — no materialized im2col slab.
        acc = jnp.dot(w_taps[0],
                      xpad_ref[b, :, off - pad: off - pad + L_pad],
                      preferred_element_type=jnp.float32)
        for k in range(1, width):
            acc = acc + jnp.dot(
                w_taps[k],
                xpad_ref[b, :, off - pad + k: off - pad + k + L_pad],
                preferred_element_type=jnp.float32)
        acc = acc + bias                                      # [2C, L_pad]
        out = acc[:C, :] * jax.nn.sigmoid(acc[C:, :])         # gated linear unit
        o_ref[b] = ((x + out) * SCALE_WEIGHT).astype(o_ref.dtype)


def _vmem_limit_bytes():
    """Generation-aware scoped-VMEM limit (~48 MiB on v7x, ~96 MiB on v5e/v6e)."""
    cap = 64 * 1024 * 1024
    try:
        info = pltpu.get_tpu_info()
        cap = int(getattr(info, "vmem_capacity_bytes", cap))
    except Exception:
        pass
    return int(cap * 3 // 4)


def _pick_batch_block(B, C, L_pad, width, num_layers, budget_bytes):
    """Largest divisor of B fitting the budget; keep >=2 grid blocks (v7x has 2 TCs)."""
    per_item = (2 * C * L_pad * 4              # input block (double-buffered)
                + 2 * C * L_pad * 4            # output/carry block (conservative x2)
                + C * (L_pad + 2 * _HALO) * 2)  # bf16 conv-window scratch
    fixed = (2 * width * (2 * C) * C * 2       # per-layer weights (double-buffered)
             + num_layers * 2 * C * 4)         # resident biases
    best = 1
    for d in range(1, B + 1):
        if B % d:
            continue
        if B >= 2 and B // d < 2:
            continue                           # keep both TensorCores busy on v7x
        if fixed + d * per_item <= budget_bytes:
            best = d
    return best


def stacked_cnn_forward(x_nchw, w_eff, bias):
    """StackedCNN forward.

    x_nchw : [B, C, L, 1]  (PyTorch NCHW layout)
    w_eff  : [num_layers, 2C, C, width]  effective (weight-norm-folded) conv weights
    bias   : [num_layers, 2C]
    returns: [B, C, L, 1]
    """
    B, C, L, one = x_nchw.shape
    num_layers, C2, Cin, width = w_eff.shape
    assert one == 1 and C2 == 2 * C and Cin == C
    assert width % 2 == 1 and width // 2 <= _HALO

    # Lane-dense sequence axis: pad L up to a multiple of 128.
    L_pad = pl.cdiv(max(L, 1), _LANE) * _LANE
    x = x_nchw[..., 0]                                     # [B, C, L]  (no transpose)
    if L_pad != L:
        x = jnp.pad(x, ((0, 0), (0, 0), (0, L_pad - L)))

    # Per-tap weights: w_pk[layer, k, o, c] = w_eff[layer, o, c, k]  (bf16 MXU inputs)
    w_pk = jnp.transpose(w_eff, (0, 3, 1, 2)).astype(jnp.bfloat16)
    b3 = bias.reshape(num_layers, 2 * C, 1).astype(jnp.float32)

    vmem_limit = _vmem_limit_bytes()
    Bb = _pick_batch_block(B, C, L_pad, width, num_layers, budget_bytes=vmem_limit // 2)

    kernel = functools.partial(_stacked_cnn_kernel, seq_len=L, width=width)

    y = pl.pallas_call(
        kernel,
        out_shape=jax.ShapeDtypeStruct((B, C, L_pad), x.dtype),
        grid_spec=pltpu.PrefetchScalarGridSpec(
            num_scalar_prefetch=0,
            grid=(B // Bb, num_layers),                    # (batch blocks, layers)
            in_specs=[
                # activation: one DMA per batch block (index independent of layer)
                pl.BlockSpec((Bb, C, L_pad), lambda bb, l: (bb, 0, 0)),
                # per-layer weights: streamed + double-buffered over the layer axis
                pl.BlockSpec((1, width, 2 * C, C), lambda bb, l: (l, 0, 0, 0)),
                # all biases resident (single DMA, indexed by layer inside the kernel)
                pl.BlockSpec((num_layers, 2 * C, 1), lambda bb, l: (0, 0, 0)),
            ],
            # resident across the layer axis; doubles as the running-activation carry
            out_specs=pl.BlockSpec((Bb, C, L_pad), lambda bb, l: (bb, 0, 0)),
            scratch_shapes=[
                pltpu.VMEM((Bb, C, L_pad + 2 * _HALO), jnp.bfloat16),  # zero-halo window
            ],
        ),
        compiler_params=pltpu.CompilerParams(
            dimension_semantics=("parallel", "arbitrary"),
            vmem_limit_bytes=vmem_limit,
        ),
    )(x, w_pk, b3)

    # Lanes beyond L may hold junk (tail masking moved to the conv input) —
    # slicing them off here is the invariant that makes that safe.
    return y[:, :, :L, None]                               # back to [B, C, L, 1]


def stacked_cnn_reference(x_nchw, w_eff, bias):
    """Pure-JAX f32 reference of the same math (no Pallas) for validation."""
    num_layers, C2, C, width = w_eff.shape
    pad = width // 2
    x = x_nchw[..., 0].astype(jnp.float32)                 # [B, C, L]
    B, _, L = x.shape
    for layer in range(num_layers):
        xp = jnp.pad(x, ((0, 0), (0, 0), (pad, pad)))
        acc = jnp.zeros((B, C2, L), jnp.float32)
        for k in range(width):
            acc = acc + jnp.einsum("oc,bcl->bol",
                                   w_eff[layer, :, :, k], xp[:, :, k:k + L])
        acc = acc + bias[layer][None, :, None]
        out = acc[:, :C] * jax.nn.sigmoid(acc[:, C:])
        x = (x + out) * SCALE_WEIGHT
    return x[..., None].astype(x_nchw.dtype)


def make_params(key, num_layers, input_size, width, dropout=0.2):
    """Deterministic weight-norm Conv2d params, folded to effective weights.

    PyTorch conv weight V: [2C, C, width, 1]; g, b: [2C].
    Effective weight = g * V / ||V|| (norm over all dims except out-channel).
    Returns w_eff: [num_layers, 2C, C, width], bias: [num_layers, 2C].
    """
    C = input_size
    keys = jax.random.split(key, 3 * num_layers)
    gain = (4.0 * (1.0 - dropout)) ** 0.5
    fan_in, fan_out = C * width, 2 * C * width
    bound = gain * (6.0 / (fan_in + fan_out)) ** 0.5       # xavier_uniform_
    w_list, b_list = [], []
    for l in range(num_layers):
        V = jax.random.uniform(
            keys[3 * l], (2 * C, C, width, 1), jnp.float32, -bound, bound)
        g = 1.0 + 0.1 * jax.random.normal(keys[3 * l + 1], (2 * C,), jnp.float32)
        b = 0.1 * jax.random.normal(keys[3 * l + 2], (2 * C,), jnp.float32)
        norm = jnp.sqrt(jnp.sum(V ** 2, axis=(1, 2, 3), keepdims=True))
        w = g[:, None, None, None] * V / norm              # [2C, C, width, 1]
        w_list.append(w[..., 0])                           # [2C, C, width]
        b_list.append(b)
    return jnp.stack(w_list, axis=0), jnp.stack(b_list, axis=0)


if __name__ == "__main__":
    num_layers = 2
    batch, hidden, max_len, width = 2, 32, 8, 3

    key = jax.random.PRNGKey(0)
    kx, kp = jax.random.split(key)
    # PyTorch layout: [batch_size, hidden_size, max_len, 1]
    x = jax.random.normal(kx, (batch, hidden, max_len, 1), jnp.float32)
    w_eff, bias = make_params(kp, num_layers, hidden, width)

    y = jax.block_until_ready(stacked_cnn_forward(x, w_eff, bias))
    y_ref = jax.block_until_ready(stacked_cnn_reference(x, w_eff, bias))

    assert y.shape == (batch, hidden, max_len, 1)
    # Kernel feeds the MXU bf16 (f32 accumulation); reference is all-f32.
    np.testing.assert_allclose(np.asarray(y), np.asarray(y_ref), rtol=5e-2, atol=5e-2)
    print("KERNEL_OK")
</pallas_src>

<mosaic_0001>
module attributes {stable_mosaic.version = 11 : i64} {
  func.func @_stacked_cnn_kernel(%arg0: i32, %arg1: i32, %arg2: memref<1x32x128xf32, #tpu.memory_space<vmem>>, %arg3: memref<1x3x64x32xbf16, #tpu.memory_space<vmem>>, %arg4: memref<2x64x1xf32, #tpu.memory_space<vmem>>, %arg5: memref<1x32x128xf32, #tpu.memory_space<vmem>>, %arg6: memref<1x32x384xbf16, #tpu.memory_space<vmem>>) attributes {dimension_semantics = [#tpu.dimension_semantics<parallel>, #tpu.dimension_semantics<arbitrary>], iteration_bounds = array<i64: 2, 2>, scalar_prefetch = 0 : i64, scratch_operands = 1 : i64, tpu.core_type = #tpu.core_type<tc>, window_params = [{transform_indices = @transform_0, window_bounds = array<i64: 1, 32, 128>}, {transform_indices = @transform_1, window_bounds = array<i64: 1, 3, 64, 32>}, {pipeline_mode = #tpu.pipeline_mode<synchronous>, transform_indices = @transform_2, window_bounds = array<i64: 2, 64, 1>}, {transform_indices = @transform_3, window_bounds = array<i64: 1, 32, 128>}]} {
    %c0_i32 = arith.constant 0 : i32
    %0 = arith.cmpi eq, %arg1, %c0_i32 : i32
    %1 = arith.extui %0 : i1 to i32
    %c0_i32_0 = arith.constant 0 : i32
    %2 = arith.cmpi ne, %1, %c0_i32_0 : i32
    scf.if %2 {
      %c0_34 = arith.constant 0 : index
      %c0_35 = arith.constant 0 : index
      %c0_36 = arith.constant 0 : index
      %49 = vector.load %arg2[%c0_34, %c0_35, %c0_36] : memref<1x32x128xf32, #tpu.memory_space<vmem>>, vector<1x32x128xf32>
      %c0_37 = arith.constant 0 : index
      %c0_38 = arith.constant 0 : index
      %c0_39 = arith.constant 0 : index
      %50 = vector.load %arg5[%c0_37, %c0_38, %c0_39] : memref<1x32x128xf32, #tpu.memory_space<vmem>>, vector<1x32x128xf32>
      tpu.vector_store %arg5[%c0_37, %c0_38, %c0_39], %49 {strides = array<i32>} : memref<1x32x128xf32, #tpu.memory_space<vmem>>, vector<1x32x128xf32>,
      %cst_40 = arith.constant 0.000000e+00 : bf16
      %51 = vector.broadcast %cst_40 : bf16 to vector<1x32x128xbf16>
      %c0_41 = arith.constant 0 : index
      %c0_42 = arith.constant 0 : index
      %c0_43 = arith.constant 0 : index
      %52 = vector.load %arg6[%c0_41, %c0_42, %c0_43] : memref<1x32x384xbf16, #tpu.memory_space<vmem>>, vector<1x32x128xbf16>
      tpu.vector_store %arg6[%c0_41, %c0_42, %c0_43], %51 {strides = array<i32>} : memref<1x32x384xbf16, #tpu.memory_space<vmem>>, vector<1x32x128xbf16>,
      %cst_44 = arith.constant 0.000000e+00 : bf16
      %53 = vector.broadcast %cst_44 : bf16 to vector<1x32x128xbf16>
      %c0_45 = arith.constant 0 : index
      %c0_46 = arith.constant 0 : index
      %c256 = arith.constant 256 : index
      %54 = vector.load %arg6[%c0_45, %c0_46, %c256] : memref<1x32x384xbf16, #tpu.memory_space<vmem>>, vector<1x32x128xbf16>
      tpu.vector_store %arg6[%c0_45, %c0_46, %c256], %53 {strides = array<i32>} : memref<1x32x384xbf16, #tpu.memory_space<vmem>>, vector<1x32x128xbf16>,
    } else {
    }
    %3 = arith.index_cast %arg1 : i32 to index
    %c0 = arith.constant 0 : index
    %c0_1 = arith.constant 0 : index
    %4 = vector.load %arg4[%3, %c0, %c0_1] : memref<2x64x1xf32, #tpu.memory_space<vmem>>, vector<1x64x1xf32>
    %5 = vector.shape_cast %4 : vector<1x64x1xf32> to vector<64x1xf32>
    %c0_2 = arith.constant 0 : index
    %c0_3 = arith.constant 0 : index
    %c0_4 = arith.constant 0 : index
    %c0_5 = arith.constant 0 : index
    %6 = vector.load %arg3[%c0_2, %c0_3, %c0_4, %c0_5] : memref<1x3x64x32xbf16, #tpu.memory_space<vmem>>, vector<1x1x64x32xbf16>
    %7 = vector.shape_cast %6 : vector<1x1x64x32xbf16> to vector<64x32xbf16>
    %c0_6 = arith.constant 0 : index
    %c1 = arith.constant 1 : index
    %c0_7 = arith.constant 0 : index
    %c0_8 = arith.constant 0 : index
    %8 = vector.load %arg3[%c0_6, %c1, %c0_7, %c0_8] : memref<1x3x64x32xbf16, #tpu.memory_space<vmem>>, vector<1x1x64x32xbf16>
    %9 = vector.shape_cast %8 : vector<1x1x64x32xbf16> to vector<64x32xbf16>
    %c0_9 = arith.constant 0 : index
    %c2 = arith.constant 2 : index
    %c0_10 = arith.constant 0 : index
    %c0_11 = arith.constant 0 : index
    %10 = vector.load %arg3[%c0_9, %c2, %c0_10, %c0_11] : memref<1x3x64x32xbf16, #tpu.memory_space<vmem>>, vector<1x1x64x32xbf16>
    %11 = vector.shape_cast %10 : vector<1x1x64x32xbf16> to vector<64x32xbf16>
    %c0_12 = arith.constant 0 : index
    %c0_13 = arith.constant 0 : index
    %c0_14 = arith.constant 0 : index
    %12 = vector.load %arg5[%c0_12, %c0_13, %c0_14] : memref<1x32x128xf32, #tpu.memory_space<vmem>>, vector<1x32x128xf32>
    %13 = vector.shape_cast %12 : vector<1x32x128xf32> to vector<32x128xf32>
    %14 = arith.truncf %13 : vector<32x128xf32> to vector<32x128xbf16>
    %c0_15 = arith.constant 0 : index
    %c0_16 = arith.constant 0 : index
    %c128 = arith.constant 128 : index
    %15 = vector.load %arg6[%c0_15, %c0_16, %c128] : memref<1x32x384xbf16, #tpu.memory_space<vmem>>, vector<1x32x128xbf16>
    %16 = vector.shape_cast %15 : vector<1x32x128xbf16> to vector<32x128xbf16>
    %17 = vector.shape_cast %14 : vector<32x128xbf16> to vector<1x32x128xbf16>
    tpu.vector_store %arg6[%c0_15, %c0_16, %c128], %17 {strides = array<i32>} : memref<1x32x384xbf16, #tpu.memory_space<vmem>>, vector<1x32x128xbf16>,
    %cst = arith.constant 0.000000e+00 : bf16
    %18 = vector.broadcast %cst : bf16 to vector<32x120xbf16>
    %c0_17 = arith.constant 0 : index
    %c0_18 = arith.constant 0 : index
    %c136 = arith.constant 136 : index
    %19 = vector.load %arg6[%c0_17, %c0_18, %c136] : memref<1x32x384xbf16, #tpu.memory_space<vmem>>, vector<1x32x120xbf16>
    %20 = vector.shape_cast %19 : vector<1x32x120xbf16> to vector<32x120xbf16>
    %21 = vector.shape_cast %18 : vector<32x120xbf16> to vector<1x32x120xbf16>
    tpu.vector_store %arg6[%c0_17, %c0_18, %c136], %21 {strides = array<i32>} : memref<1x32x384xbf16, #tpu.memory_space<vmem>>, vector<1x32x120xbf16>,
    %c0_19 = arith.constant 0 : index
    %c0_20 = arith.constant 0 : index
    %c127 = arith.constant 127 : index
    %22 = vector.load %arg6[%c0_19, %c0_20, %c127] : memref<1x32x384xbf16, #tpu.memory_space<vmem>>, vector<1x32x128xbf16>
    %23 = vector.shape_cast %22 : vector<1x32x128xbf16> to vector<32x128xbf16>
    %cst_21 = arith.constant dense<0.000000e+00> : vector<64x128xf32>
    %24 = tpu.matmul %7, %23, %cst_21 {dimension_numbers = #tpu.dot_dimension_numbers<[1], [0], [0], [1], [0, 0, 1, 1], [], []>} : vector<64x32xbf16>, vector<32x128xbf16>, vector<64x128xf32> -> vector<64x128xf32>
    %c0_22 = arith.constant 0 : index
    %c0_23 = arith.constant 0 : index
    %c128_24 = arith.constant 128 : index
    %25 = vector.load %arg6[%c0_22, %c0_23, %c128_24] : memref<1x32x384xbf16, #tpu.memory_space<vmem>>, vector<1x32x128xbf16>
    %26 = vector.shape_cast %25 : vector<1x32x128xbf16> to vector<32x128xbf16>
    %cst_25 = arith.constant dense<0.000000e+00> : vector<64x128xf32>
    %27 = tpu.matmul %9, %26, %cst_25 {dimension_numbers = #tpu.dot_dimension_numbers<[1], [0], [0], [1], [0, 0, 1, 1], [], []>} : vector<64x32xbf16>, vector<32x128xbf16>, vector<64x128xf32> -> vector<64x128xf32>
    %28 = arith.addf %24, %27 : vector<64x128xf32>
    %c0_26 = arith.constant 0 : index
    %c0_27 = arith.constant 0 : index
    %c129 = arith.constant 129 : index
    %29 = vector.load %arg6[%c0_26, %c0_27, %c129] : memref<1x32x384xbf16, #tpu.memory_space<vmem>>, vector<1x32x128xbf16>
    %30 = vector.shape_cast %29 : vector<1x32x128xbf16> to vector<32x128xbf16>
    %cst_28 = arith.constant dense<0.000000e+00> : vector<64x128xf32>
    %31 = tpu.matmul %11, %30, %cst_28 {dimension_numbers = #tpu.dot_dimension_numbers<[1], [0], [0], [1], [0, 0, 1, 1], [], []>} : vector<64x32xbf16>, vector<32x128xbf16>, vector<64x128xf32> -> vector<64x128xf32>
    %32 = arith.addf %28, %31 : vector<64x128xf32>
    %33 = vector.broadcast %5 : vector<64x1xf32> to vector<64x128xf32>
    %34 = arith.addf %32, %33 : vector<64x128xf32>
    %35 = vector.extract_strided_slice %34 {offsets = [0, 0], sizes = [32, 128], strides = [1, 1]} : vector<64x128xf32> to vector<32x128xf32>
    %36 = vector.extract_strided_slice %34 {offsets = [32, 0], sizes = [32, 128], strides = [1, 1]} : vector<64x128xf32> to vector<32x128xf32>
    %37 = arith.negf %36 : vector<32x128xf32>
    %38 = math.exp %37 : vector<32x128xf32>
    %cst_29 = arith.constant 1.000000e+00 : f32
    %39 = vector.broadcast %cst_29 : f32 to vector<32x128xf32>
    %40 = arith.addf %39, %38 : vector<32x128xf32>
    %41 = arith.divf %39, %40 : vector<32x128xf32>
    %42 = arith.mulf %35, %41 : vector<32x128xf32>
    %43 = arith.addf %13, %42 : vector<32x128xf32>
    %cst_30 = arith.constant 0.707106769 : f32
    %44 = vector.broadcast %cst_30 : f32 to vector<32x128xf32>
    %45 = arith.mulf %43, %44 : vector<32x128xf32>
    %c0_31 = arith.constant 0 : index
    %c0_32 = arith.constant 0 : index
    %c0_33 = arith.constant 0 : index
    %46 = vector.load %arg5[%c0_31, %c0_32, %c0_33] : memref<1x32x128xf32, #tpu.memory_space<vmem>>, vector<1x32x128xf32>
    %47 = vector.shape_cast %46 : vector<1x32x128xf32> to vector<32x128xf32>
    %48 = vector.shape_cast %45 : vector<32x128xf32> to vector<1x32x128xf32>
    tpu.vector_store %arg5[%c0_31, %c0_32, %c0_33], %48 {strides = array<i32>} : memref<1x32x128xf32, #tpu.memory_space<vmem>>, vector<1x32x128xf32>,
    return
  }
  func.func @transform_0(%arg0: i32, %arg1: i32) -> (i32, i32, i32) {
    %c0_i32 = arith.constant 0 : i32
    %c0_i32_0 = arith.constant 0 : i32
    %c0_i32_1 = arith.constant 0 : i32
    return %arg0, %c0_i32, %c0_i32_0 : i32, i32, i32
  }
  func.func @transform_1(%arg0: i32, %arg1: i32) -> (i32, i32, i32, i32) {
    %c0_i32 = arith.constant 0 : i32
    %c0_i32_0 = arith.constant 0 : i32
    %c0_i32_1 = arith.constant 0 : i32
    %c0_i32_2 = arith.constant 0 : i32
    return %arg1, %c0_i32, %c0_i32_0, %c0_i32_1 : i32, i32, i32, i32
  }
  func.func @transform_2(%arg0: i32, %arg1: i32) -> (i32, i32, i32) {
    %c0_i32 = arith.constant 0 : i32
    %c0_i32_0 = arith.constant 0 : i32
    %c0_i32_1 = arith.constant 0 : i32
    %c0_i32_2 = arith.constant 0 : i32
    return %c0_i32, %c0_i32_0, %c0_i32_1 : i32, i32, i32
  }
  func.func @transform_3(%arg0: i32, %arg1: i32) -> (i32, i32, i32) {
    %c0_i32 = arith.constant 0 : i32
    %c0_i32_0 = arith.constant 0 : i32
    %c0_i32_1 = arith.constant 0 : i32
    return %arg0, %c0_i32, %c0_i32_0 : i32, i32, i32
  }
}

</mosaic_0001>

<bundles_post_ra>
// kernel: tpu_custom_call.1
= control target key start
LH: loop header
LB: loop body
LE: loop exit
PB: predicated region body
PF: predicated region fallthrough
CT: control target
= control target key end

     0   :  { %8 = vsyncpa [#allocation4], 0  ;;  %s1371_s0 = inlined_call_operand.vmem [shape: f32[2,32,128], index: 0, kind: input, shape index: {}]   ;;  %s1372_s1 = inlined_call_operand.vmem [shape: bf16[2,3,64,32], index: 1, kind: input, shape index: {}]   ;;  %s1373_s2 = inlined_call_operand.vmem [shape: f32[2,64,1], index: 2, kind: input, shape index: {}]   ;;  %s1374_s3 = inlined_call_operand.hbm [shape: f32[2,32,128], index: 3, kind: output, shape index: {}]  }
   0x1   :  { %10 = vsyncpa [#allocation4 + $0x1], 0  ;;  %s1163_s12 = smov 0   ;;  %s1165_s13 = smov 0  }
   0x2   :  { %s1167_s14 = smov 0   ;;  %s1169_s15 = smov 0  }
   0x3   :  { %s1171_s16 = smov 0   ;;  %s1173_s17 = smov 0  }
   0x4   :  { %s1175_s18 = smov 0   ;;  %s1177_s19 = smov 0  }
   0x5 LB: > { %s796_s20 = sadd.s32 4294967295, %s1134_s19   ;;  %s797_s21 = sadd.s32 4294967294, %s1134_s19   ;;  %s1134_s19 = sphi %s1177_s19, %s16_s19   ;;  %s1130_s18 = sphi %s1175_s18, %s1383_s18   ;;  %s1126_s17 = sphi %s1173_s17, %s1382_s17   ;;  %s1122_s16 = sphi %s1171_s16, %s1381_s16   ;;  %s1118_s15 = sphi %s1169_s15, %s1380_s15   ;;  %s1114_s14 = sphi %s1167_s14, %s1379_s14   ;;  %s1110_s13 = sphi %s1165_s13, %s1378_s13   ;;  %s1106_s12 = sphi %s1163_s12, %s1377_s12  }
   0x6   : > { %s25_s22 = sadd.s32 1, %s1126_s17  ;;  %s28_s23 = sadd.s32 1, %s1130_s18 }
   0x7   : > { %p26_p0 = scmp.ge.s32.totalorder %s25_s22, 2  ;;  %p118_p1 = scmp.ne.s32.totalorder %s1114_s14, %s1110_s13 }
   0x8   : > { %p119_p2 = scmp.eq.s32.totalorder %s796_s20, 3  ;;  %p124_p4 = scmp.ne.s32.totalorder %s1110_s13, %s1106_s12 }
   0x9   : > { %s1385_s22 = smov (%p26_p0, %s25_s22), 0  ;;  %s1387_s23 = smov (!%p26_p0, %s28_s23), %s1130_s18 }
   0xa   : > { %p1212_p3 = por %p119_p2, %p118_p1  ;;  %p30_p5 = scmp.ge.s32.totalorder %s1387_s23, 2 }
   0xb   : > { %p125_p6 = scmp.eq.s32.totalorder %s797_s21, 3  ;;  %p800_p7 = scmp.ge.s32.totalorder %s1134_s19, 1 }
   0xc   : > { %p162_p8 = scmp.lt.s32.totalorder %s1134_s19, 5  ;;  %s1389_s23 = smov (%p30_p5, %s1387_s23), 0 }
   0xd   : > { %p1222_p9 = por %p125_p6, %p124_p4  ;;  %s105_s26 = ssub.s32 %s1130_s18, %s1389_s23 }
   0xe   : > { %p163_p10 = pnand %p800_p7, %p162_p8  ;;  %s108_s27 = sadd.s32 1, %s1114_s14 }
   0xf   : > { %p106_p11 = scmp.eq.s32.totalorder %s105_s26, 0  ;;  %s188_s29 = sand.u32 (!%p163_p10), 1, %s1110_s13  }
  0x10   : > { %166 = sbr.rel (%p163_p10) target bundleno = 457 (0x1c9), region = 32  ;;  %p191_p12 = scmp.lt.s32.totalorder (!%p163_p10), %s1122_s16, 1 }
  0x11   : > { %s1230_s28 = scalar_select %p106_p11, %s1114_s14, %s108_s27  }
  0x12   : > { %s801_s30 = sshll.u32 (!%p163_p10), %s188_s29, 5  ;;  %p196_p13 = scmp.lt.s32.totalorder (!%p163_p10), %s1118_s15, 1 }
  0x13   : > { %s1247_s26 = scalar_lea.vmem (!%p163_p10), [#allocation3], %s801_s30  ;;  %p805_p0 = scmp.ne.s32.totalorder (!%p163_p10), %s1118_s15, 0 }
  0x17   : > { %s192_s4 = scalar_select %p191_p12, %s1122_s16, 1 }
  0x18   : > { %s197_s5 = scalar_select %p196_p13, %s1118_s15, 1 }
  0x19   : > { %s856_s6 = sshll.u32 %s192_s4, 5  ;;  %205 = sbr.rel (%p805_p0) target bundleno = 32 (0x20), region = 36  ;;  %v1136_v4 = vmov (!%p805_p0), 0  }
  0x1a   : > { %s195_s9 = scalar_lea.vmem %s1371_s0, %s856_s6  ;;  %s932_s10 = smul.u32 96, %s197_s5  ;;  %214 = vst [vmem:[#allocation2] sm:$0xff] (!%p805_p0), %v1136_v4  ;;  %215 = vst [vmem:[#allocation2 + $0x18] sm:$0xff] (!%p805_p0), %v1136_v4 }
  0x1b   : > { %v206_v0 = vld [vmem:[%s195_s9] sm:$0xff] (!%p805_p0)  ;;  %v207_v1 = vld [vmem:[%s195_s9 + $0x8] sm:$0xff] (!%p805_p0)  ;;  %v208_v2 = vld [vmem:[%s195_s9 + $0x10] sm:$0xff] (!%p805_p0)  ;;  %216 = vst [vmem:[#allocation2 + $0x10] sm:$0xff] (!%p805_p0), %v1136_v4 }
  0x1c   : > { %s1245_s21 = scalar_lea.vmem %s1372_s1, %s932_s10  ;;  %210 = vst [vmem:[%s1247_s26] sm:$0xff] (!%p805_p0), %v206_v0  ;;  %211 = vst [vmem:[%s1247_s26 + $0x8] sm:$0xff] (!%p805_p0), %v207_v1  ;;  %v209_v3 = vld [vmem:[%s195_s9 + $0x18] sm:$0xff] (!%p805_p0) }
  0x1d   : > { %212 = vst [vmem:[%s1247_s26 + $0x10] sm:$0xff] (!%p805_p0), %v208_v2  ;;  %217 = vst [vmem:[#allocation2 + $0x28] sm:$0xff] (!%p805_p0), %v1136_v4 }
  0x1e   : > { %213 = vst [vmem:[%s1247_s26 + $0x18] sm:$0xff] (!%p805_p0), %v209_v3 }
  0x20 PF: > { %s1137_s27 = smov 1   ;;  %vm262_vm0 = vcmask 1047616   ;;  %vm289_vm1 = vcmask 261120   ;;  %v1138_v12 = vmov 0   ;;  %v1012_v14 = vld [vmem:[%s1245_s21 + $0x20] sm:$0xff]   ;;  %s1139_s30 = smov 127  }
  0x21   : > { %v267_v5 = vld [vmem:[#allocation2 + $0x18] sm:$0xff]  ;;  %v265_v6 = vld [vmem:[#allocation2] sm:$0xff]  ;;  %1011 = vset.pattern.permute.xlu1 %v1138_v12  ;;  %1010 = vset.pattern.permute.xlu0 %v1138_v12  ;;  %v1013_v20 = vld [vmem:[%s1245_s21 + $0x28] sm:$0xff]   ;;  %s806_s4 = sshll.u32 %s1118_s15, 6  ;;  %vm399_vm2 = vcmask 7168   ;;  %vm517_vm3 = vcmask 1039360  }
  0x22   : > { %395 = vrot.lane.b32.xlu1 %v267_v5, %s1137_s27  ;;  %391 = vrot.lane.b32.xlu0 %v265_v6, %s1137_s27  ;;  %v1016_v15 = vld [vmem:[%s1245_s21] sm:$0xff]   ;;  %v482_v18 = vld [vmem:[#allocation2 + $0x10] sm:$0xff]  ;;  %v1015_v22 = vld [vmem:[%s1245_s21 + $0x38] sm:$0xff]   ;;  %s219_s7 = scalar_lea.vmem %s1373_s2, %s806_s4  ;;  %s857_s15 = sshll.u32 %s1122_s16, 9 }
  0x23   : > { %v1261_v9 = vld [vmem:[%s1247_s26] sm:$0xff]  ;;  %v1266_v11 = vld [vmem:[%s1247_s26 + $0x8] sm:$0xff]  ;;  %880 = vmatprep.mubr.msk.bf16.mxu1 %vm289_vm1, %v1012_v14  ;;  %892 = vmatprep.mubr.msk.bf16.mxu0 %vm289_vm1, %v1016_v15  ;;  %v225_v24 = vld [vmem:[%s219_s7 + $0x28] sm:$0xff]  ;;  %s709_s8 = sshll.u32 %s1247_s26, 4  ;;  %s1310_s11 = scalar_lea.hbm %s1374_s3, %s857_s15  ;;  %s1312_s8 = int_to_ptr.vmem [resolvable:$true] %s709_s8 }
  0x24   : > { %v1255_v7 = vld [vmem:[%s1247_s26 + $0x10] sm:$0xff]  ;;  %v258_v13 = vpack.c.bf16 %v1266_v11, %v1261_v9  ;;  %v484_v19 = vld [vmem:[#allocation2 + $0x28] sm:$0xff]  ;;  %v1014_v21 = vld [vmem:[%s1245_s21 + $0x30] sm:$0xff]   ;;  %s1319_s16 = scalar_lea.sflag [#allocation4], %s188_s29  ;;  %s1040_s20 = scalar_lea.vmem %s1312_s8, 512 }
  0x25   : > { %v1258_v8 = vld [vmem:[%s1247_s26 + $0x18] sm:$0xff]  ;;  %v1018_v23 = vld [vmem:[%s1245_s21 + $0x10] sm:$0xff]   ;;  %v224_v25 = vld [vmem:[%s219_s7 + $0x20] sm:$0xff]  ;;  %p1041_p1 = scmp.ne.s32.totalorder %s1312_s8, %s1040_s20 }
  0x26   : > { %v259_v10 = vpack.c.bf16 %v1258_v8, %v1255_v7  ;;  %260 = vst [vmem:[#allocation2 + $0x8] sm:$0xff] %v258_v13  ;;  %v226_v26 = vld [vmem:[%s219_s7 + $0x30] sm:$0xff]  ;;  %v227_v27 = vld [vmem:[%s219_s7 + $0x38] sm:$0xff]  ;;  %v220_v28 = vld [vmem:[%s219_s7] sm:$0xff] }
  0x27   : > { %263 = vst.msk [vmem:[#allocation2 + $0x8] sm:$0xff] %vm262_vm0, %v1138_v12  ;;  %v221_v29 = vld [vmem:[%s219_s7 + $0x8] sm:$0xff]  ;;  %v222_v30 = vld [vmem:[%s219_s7 + $0x10] sm:$0xff]  ;;  %v223_v31 = vld [vmem:[%s219_s7 + $0x18] sm:$0xff]  ;;  %p1042_p2 = pnand %p1041_p1, %p1212_p3 }
  0x28   : > { %261 = vst [vmem:[#allocation2 + $0x20] sm:$0xff] %v259_v10  ;;  %v1017_v41 = vld [vmem:[%s1245_s21 + $0x8] sm:$0xff]   ;;  %v1019_v42 = vld [vmem:[%s1245_s21 + $0x18] sm:$0xff]   ;;  %v1020_v44 = vld [vmem:[%s1245_s21 + $0x40] sm:$0xff]  }
  0x29   : > { %264 = vst.msk [vmem:[#allocation2 + $0x20] sm:$0xff] %vm262_vm0, %v1138_v12  ;;  %v1021_v47 = vld [vmem:[%s1245_s21 + $0x48] sm:$0xff]   ;;  %v1022_v48 = vld [vmem:[%s1245_s21 + $0x50] sm:$0xff]   ;;  %v1023_v49 = vld [vmem:[%s1245_s21 + $0x58] sm:$0xff]   ;;  %p1043_p4 = pneg %p1042_p2  ;;  %s1140_s21 = smov [#allocation3]  }
  0x2e   : > { %v266_v17 = vld [vmem:[#allocation2 + $0x8] sm:$0xff] }
  0x2f   : > { %393 = vrot.lane.b32.xlu0 %v266_v17, %s1137_s27  ;;  %876 = vmatprep.subr.bf16.mxu1 %v266_v17 }
  0x30   : > { %v268_v16 = vld [vmem:[#allocation2 + $0x20] sm:$0xff]  ;;  %877 = vmatpush3.bf16.msra.mxu1 %v266_v17 }
  0x31   : > { %397 = vrot.lane.b32.xlu1 %v268_v16, %s1137_s27  ;;  %878 = vmatprep.subr.bf16.mxu1 %v268_v16  ;;  %s1044_s27 = sshll.u32 %s1140_s21, 4  ;;  %s1045_s27 = int_to_ptr.vmem [resolvable:$false] %s1044_s27 }
  0x32   : > { %p1047_p5 = scmp.lt.s32.totalorder %s1312_s8, %s1045_s27 }
  0x33   : > { %509 = vrot.lane.b32.xlu0 %v266_v17, %s1139_s30 }
  0x34   : > { %879 = vmatpush3.bf16.msra.mxu1 %v268_v16 }
  0x35   : > { %511 = vrot.lane.b32.xlu1 %v482_v18, %s1139_s30 }
  0x37   : > { %513 = vrot.lane.b32.xlu0 %v268_v16, %s1139_s30  ;;  %881 = vmatmul.mubr.msk.bf16.vlgmr.msra.gmra.mrb[0].mxu1 %vm289_vm1, %v1013_v20 }
  0x38   : > { %884 = vmatprep.mubr.msk.bf16.mxu1 %vm289_vm1, %v1014_v21 }
  0x39   : > { %515 = vrot.lane.b32.xlu1 %v484_v19, %s1139_s30  ;;  %s1046_s30 = scalar_lea.vmem %s1045_s27, 1024 }
  0x3a   : > { %p1048_p6 = scmp.lt.s32.totalorder %s1046_s30, %s1040_s20 }
  0x3b   : > { %629 = vperm.xlu0 %1010, %v224_v25  }
  0x3c   : > { %p1049_p7 = por %p1048_p6, %p1047_p5 }
  0x3d   : > { %634 = vperm.xlu1 %1011, %v225_v24  }
  0x3e   : > { %p1050_p8 = pnand %p1049_p7, %p1043_p4 }
  0x3f   : > { %885 = vmatmul.mubr.msk.bf16.gmra.mrb[4].mxu1 %vm289_vm1, %v1015_v22  ;;  %644 = vperm.xlu0 %1010, %v227_v27  }
  0x40   : > { %896 = vmatprep.mubr.msk.bf16.mxu1 %vm289_vm1, %v1018_v23 }
  0x41   : > { %639 = vperm.xlu1 %1011, %v226_v26  }
  0x43   : > { %614 = vperm.xlu0 %1010, %v221_v29  }
  0x45   : > { %609 = vperm.xlu1 %1011, %v220_v28  }
  0x47   : > { %624 = vperm.xlu0 %1010, %v223_v31  }
  0x49   : > { %619 = vperm.xlu1 %1011, %v222_v30  }
  0x94   : > { %v396_v32 = vpop.permute.xlu1 %395  ;;  %v392_v33 = vpop.permute.xlu0 %391 }
  0xa1   : > { %v394_v35 = vpop.permute.xlu0 %393 }
  0xa2   : > { %v400_v36 = vsel %vm399_vm2, %v392_v33, %v394_v35 }
  0xa3   : > { %v398_v34 = vpop.permute.xlu1 %397  ;;  %888 = vmatprep.subr.bf16.mxu0 %v400_v36  ;;  %912 = vmatprep.subr.bf16.mxu1 %v400_v36 }
  0xa4   : > { %v401_v37 = vsel %vm399_vm2, %v396_v32, %v398_v34  ;;  %889 = vmatpush3.bf16.msra.mxu0 %v400_v36  ;;  %914 = vmatpush3.bf16.msra.mxu1 %v400_v36 }
  0xa5   : > { %890 = vmatprep.subr.bf16.mxu0 %v401_v37  ;;  %913 = vmatprep.subr.bf16.mxu1 %v401_v37  ;;  %v510_v39 = vpop.permute.xlu0 %509 }
  0xa7   : > { %v512_v38 = vpop.permute.xlu1 %511 }
  0xa8   : > { %v518_v40 = vsel %vm517_vm3, %v510_v39, %v512_v38  ;;  %891 = vmatpush3.bf16.msra.mxu0 %v401_v37  ;;  %915 = vmatpush3.bf16.msra.mxu1 %v401_v37 }
  0xa9   : > { %900 = vmatprep.subr.bf16.mxu0 %v518_v40  ;;  %v514_v45 = vpop.permute.xlu0 %513 }
  0xab   : > { %v516_v43 = vpop.permute.xlu1 %515  ;;  %893 = vmatmul.mubr.msk.bf16.vlgmr.msra.gmra.mrb[0].mxu0 %vm289_vm1, %v1017_v41  ;;  %897 = vmatmul.mubr.msk.bf16.vlgmr.msra.gmra.mrb[4].mxu1 %vm289_vm1, %v1019_v42 }
  0xac   : > { %v519_v46 = vsel %vm517_vm3, %v514_v45, %v516_v43  ;;  %901 = vmatpush3.bf16.msra.mxu0 %v518_v40  ;;  %904 = vmatprep.mubr.msk.bf16.mxu0 %vm289_vm1, %v1020_v44 }
  0xad   : > { %902 = vmatprep.subr.bf16.mxu0 %v519_v46 }
  0xb0   : > { %903 = vmatpush3.bf16.msra.mxu0 %v519_v46 }
  0xb7   : > { %905 = vmatmul.mubr.msk.bf16.vlgmr.msra.gmra.mrb[0].mxu0 %vm289_vm1, %v1021_v47 }
  0xb8   : > { %908 = vmatprep.mubr.msk.bf16.mxu0 %vm289_vm1, %v1022_v48 }
  0xba   : > { %v630_v3 = vpop.permute.xlu0 %629 }
  0xbc   : > { %v635_v1 = vpop.permute.xlu1 %634 }
  0xbe   : > { %v645_v17 = vpop.permute.xlu0 %644 }
  0xbf   : > { %909 = vmatmul.mubr.msk.bf16.gmra.mrb[4].mxu0 %vm289_vm1, %v1023_v49 }
  0xc0   : > { %v640_v10 = vpop.permute.xlu1 %639 }
  0xc2   : > { %v615_v35 = vpop.permute.xlu0 %614 }
  0xc4   : > { %v610_v32 = vpop.permute.xlu1 %609 }
  0xc6   : > { %v625_v37 = vpop.permute.xlu0 %624 }
  0xc8   : > { %v620_v36 = vpop.permute.xlu1 %619 }
 0x10a   : > { %v882_v50 = vpop.f32.mrb[0].mxu1 }
 0x10b   : > { %v336_v51 = vpop.f32.mrb[1].mxu1 }
 0x10c   : > { %v883_v52 = vpop.f32.mrb[2].mxu1 }
 0x10d   : > { %v339_v53 = vpop.f32.mrb[3].mxu1 }
 0x17e   : > { %v898_v54 = vpop.f32.mrb[4].mxu1 }
 0x17f   : > { %v466_v55 = vpop.f32.mrb[5].mxu1 }
 0x180   : > { %v899_v56 = vpop.f32.mrb[6].mxu1 }
 0x181   : > { %v469_v57 = vpop.f32.mrb[7].mxu1 }
 0x18a   : > { %v906_v58 = vpop.f32.mrb[0].mxu0 }
 0x18b   : > { %v916_v59 = vadd.f32 %v906_v58, %v882_v50  ;;  %v568_v60 = vpop.f32.mrb[1].mxu0 }
 0x18c   : > { %v917_v61 = vadd.f32 %v568_v60, %v336_v51  ;;  %v907_v62 = vpop.f32.mrb[2].mxu0 }
 0x18d   : > { %v918_v63 = vadd.f32 %v907_v62, %v883_v52  ;;  %v571_v0 = vpop.f32.mrb[3].mxu0  ;;  %v649_v38 = vadd.f32 %v916_v59, %v620_v36 }
 0x18e   : > { %v919_v2 = vadd.f32 %v571_v0, %v339_v53  ;;  %v647_v40 = vadd.f32 %v917_v61, %v610_v32 }
 0x18f   : > { %v650_v42 = vadd.f32 %v918_v63, %v625_v37 }
 0x190   : > { %v648_v45 = vadd.f32 %v919_v2, %v615_v35 }
 0x192   : > { %v910_v4 = vpop.f32.mrb[4].mxu0 }
 0x193   : > { %v920_v5 = vadd.f32 %v910_v4, %v898_v54  ;;  %v584_v6 = vpop.f32.mrb[5].mxu0 }
 0x194   : > { %v921_v12 = vadd.f32 %v584_v6, %v466_v55  ;;  %v911_v13 = vpop.f32.mrb[6].mxu0 }
 0x195   : > { %v653_v14 = vadd.f32 %v920_v5, %v640_v10  ;;  %v922_v15 = vadd.f32 %v911_v13, %v899_v56  ;;  %v587_v16 = vpop.f32.mrb[7].mxu0 }
 0x196   : > { %v651_v18 = vadd.f32 %v921_v12, %v630_v3  ;;  %v923_v19 = vadd.f32 %v587_v16, %v469_v57 }
 0x197   : > { %v849_v20 = vmul.f32 -1.442695, %v653_v14  ;;  %v654_v21 = vadd.f32 %v922_v15, %v645_v17 }
 0x198   : > { %v847_v22 = vmul.f32 -1.442695, %v651_v18  ;;  %v652_v23 = vadd.f32 %v923_v19, %v635_v1 }
 0x199   : > { %1024 = vpow2.f32 %v849_v20  ;;  %v850_v24 = vmul.f32 -1.442695, %v654_v21 }
 0x19a   : > { %1026 = vpow2.f32 %v847_v22  ;;  %v848_v25 = vmul.f32 -1.442695, %v652_v23 }
 0x19b   : > { %1028 = vpow2.f32 %v850_v24 }
 0x19c   : > { %1030 = vpow2.f32 %v848_v25 }
 0x1a3   : > { %v1025_v26 = vpop.eup %1024 }
 0x1a4   : > { %v1027_v27 = vpop.eup %1026  ;;  %v669_v28 = vadd.f32 1.0, %v1025_v26 }
 0x1a5   : > { %v1029_v29 = vpop.eup %1028  ;;  %v667_v30 = vadd.f32 1.0, %v1027_v27 }
 0x1a6   : > { %v1031_v31 = vpop.eup %1030  ;;  %1032 = vrcp.f32 %v669_v28  ;;  %v670_v33 = vadd.f32 1.0, %v1029_v29 }
 0x1a7   : > { %1034 = vrcp.f32 %v667_v30  ;;  %v668_v34 = vadd.f32 1.0, %v1031_v31 }
 0x1a8   : > { %1036 = vrcp.f32 %v670_v33 }
 0x1a9   : > { %1038 = vrcp.f32 %v668_v34 }
 0x1b0   : > { %v1033_v39 = vpop.eup %1032 }
 0x1b1   : > { %v1035_v41 = vpop.eup %1034  ;;  %v681_v43 = vmul.f32 %v1033_v39, %v649_v38 }
 0x1b2   : > { %v1037_v44 = vpop.eup %1036  ;;  %v679_v46 = vmul.f32 %v1035_v41, %v647_v40 }
 0x1b3   : > { %v1039_v47 = vpop.eup %1038  ;;  %v685_v48 = vadd.f32 %v681_v43, %v1255_v7  ;;  %v682_v49 = vmul.f32 %v1037_v44, %v650_v42 }
 0x1b4   : > { %v683_v50 = vadd.f32 %v679_v46, %v1261_v9  ;;  %v680_v51 = vmul.f32 %v1039_v47, %v648_v45 }
 0x1b5   : > { %v689_v52 = vmul.f32 0.70710677, %v685_v48  ;;  %v686_v53 = vadd.f32 %v682_v49, %v1258_v8 }
 0x1b6   : > { %v687_v54 = vmul.f32 0.70710677, %v683_v50  ;;  %v684_v55 = vadd.f32 %v680_v51, %v1266_v11 }
 0x1b7   : > { %693 = vst [vmem:[%s1247_s26 + $0x10] sm:$0xff] %v689_v52  ;;  %v690_v56 = vmul.f32 0.70710677, %v686_v53 }
 0x1b8   : > { %691 = vst [vmem:[%s1247_s26] sm:$0xff] %v687_v54  ;;  %v688_v7 = vmul.f32 0.70710677, %v684_v55 }
 0x1b9   : > { %694 = vst [vmem:[%s1247_s26 + $0x18] sm:$0xff] %v690_v56 }
 0x1ba   : > { %692 = vst [vmem:[%s1247_s26 + $0x8] sm:$0xff] %v688_v7 }
 0x1bb   : > { %1053 = shalt.err (!%p1050_p8)
}
 0x1bc   : > { %s1054_s29 = scalar_lea.hbm %s1310_s11, 512  ;;  %s1058_s5 = scalar_lea.hbm %s1374_s3, 1024 }
 0x1bd   : > { %p1055_p10 = scmp.ne.s32.totalorder %s1310_s11, %s1054_s29  ;;  %p1059_p13 = scmp.lt.u32.totalorder %s1310_s11, %s1374_s3 }
 0x1be   : > { %p1060_p0 = scmp.lt.u32.totalorder %s1058_s5, %s1054_s29  ;;  %p1062_p2 = scmp.lt.u32.totalorder %s1054_s29, %s1310_s11 }
 0x1bf   : > { %p1056_p11 = pnand %p1055_p10, %p1212_p3 }
 0x1c0   : > { %p1061_p1 = por %p1060_p0, %p1059_p13 }
 0x1c1   : > { %p1057_p12 = pneg %p1056_p11 }
 0x1c2   : > { %p1063_p4 = por %p1062_p2, %p1061_p1 }
 0x1c4   : > { %p1064_p5 = pnand %p1063_p4, %p1057_p12 }
 0x1c6   : > { %1067 = shalt.err (!%p1064_p5)
}
 0x1c7   : > { %s1141_s15 = smov 128   ;;  %s1142_s9 = smov 8  }
 0x1c8   : > { %933 = dma.vmem_to_hbm [thread:$0]  (%p1212_p3), %s1312_s8, 512, %s1310_s11, %s1319_s16, %s1141_s15, %s1141_s15, %s1142_s9  }
 0x1c9 PF: > { %p939_p6 = scmp.ge.s32.totalorder %s1134_s19, 2  ;;  %s724_s10 = sand.u32 1, %s1106_s12  }
 0x1ca   : > { %s725_s20 = scalar_lea.sflag [#allocation4], %s724_s10 }
 0x1cb   : > { %p936_p7 = pnand %p939_p6, %p1222_p9 }
 0x1cd   : > { %1101 = dma.done.wait (!%p936_p7), %s725_s20, 512  }
 0x1ce   : > { %1103 = vsyncadd (!%p936_p7), %s725_s20, 4294966784  ;;  %s16_s19 = sadd.s32 1, %s1134_s19   ;;  %s1377_s12 = smov %s1110_s13 }
 0x1cf   : > { %p13_p8 = scmp.ge.s32.totalorder %s16_s19, 6   ;;  %s1378_s13 = smov %s1114_s14 }
 0x1d0   : > { %s1379_s14 = smov %s1230_s28  ;;  %s1380_s15 = smov %s1126_s17 }
 0x1d1   : > { %s1381_s16 = smov %s1130_s18  ;;  %s1382_s17 = smov %s1385_s22 }
 0x1d2   : > { %s1383_s18 = smov %s1389_s23  ;;  %15 = sbr.rel (!%p13_p8) target bundleno = 5 (0x5), region = 77 }
 0x1d9   :  { %730 = vsyncpa [#allocation4], 1 }
 0x1da   :  { %732 = vsyncpa [#allocation4 + $0x1], 1 }

</bundles_post_ra>
